<compile_context>
chip_gen: v5e
topology: v5e:2x2
jax: 0.10.0
libtpu: 0.0.40
codegen_flags: <defaults>
</compile_context>

<pallas_src>
import math
import functools

import jax
import jax.numpy as jnp
from jax.experimental import pallas as pl
from jax.experimental.pallas import tpu as pltpu

# ---- problem constants implied by the original script -----------------------
cell_num = 3
road_num = 9
agent_num = road_num * (cell_num + 1)                 # 36
STATE_DIM = 3
ACTION_DIM = cell_num + 1                             # 4
INPUT_DIM = 1 + STATE_DIM * agent_num + agent_num     # 1 + 108 + 36 = 145
HIDDEN = 64

TILE_B_DEFAULT = 4096   # rows per grid step (VMEM ~11 MiB with bf16 x / f32 out)
MIN_TILE_B = 1024       # floor when enforcing >=4 grid steps (v7x megacore)


def _round_up(x, m):
    return ((x + m - 1) // m) * m


def _pick_tile(B, tile_b, align):
    """Batch tile: multiple of `align`; keep >=4 grid steps for large B (v7x)."""
    tb = min(tile_b, _round_up(B, align))
    if B >= 4 * MIN_TILE_B:
        tb = min(tb, max(MIN_TILE_B, _round_up(-(-B // 4), align)))
    return tb


def _flops_bytes(B, x, params):
    flops = 2 * B * (INPUT_DIM * HIDDEN + HIDDEN * HIDDEN + HIDDEN * ACTION_DIM)
    bytes_accessed = (
        x.size * x.dtype.itemsize
        + sum(int(p.size) * p.dtype.itemsize for p in params)
        + B * ACTION_DIM * 4)
    return flops, bytes_accessed


# =============================================================================
# Batch-major kernel: x (tb, INPUT_DIM) rows on sublanes, features on lanes.
# =============================================================================
def critic2_kernel(x_ref, w1_ref, b1_ref, w2_ref, b2_ref, w3_ref, b3_ref, o_ref):
    """relu(x@W1+b1) -> relu(.@W2+b2) -> .@W3+b3 on one batch tile.

    Weights/biases are VMEM-resident across all grid steps (constant
    index_map); intermediates never leave VMEM; f32 accumulation throughout.
    """
    x = x_ref[...]
    h1 = jnp.dot(x, w1_ref[...], preferred_element_type=jnp.float32) + b1_ref[...]
    h1 = jnp.maximum(h1, 0.0)
    h2 = jnp.dot(h1.astype(w2_ref.dtype), w2_ref[...],
                 preferred_element_type=jnp.float32) + b2_ref[...]
    h2 = jnp.maximum(h2, 0.0)
    out = jnp.dot(h2.astype(w3_ref.dtype), w3_ref[...],
                  preferred_element_type=jnp.float32) + b3_ref[...]
    o_ref[...] = out.astype(o_ref.dtype)


@functools.partial(jax.jit, static_argnames=("tile_b",))
def critic2_forward(x, params, *, tile_b=TILE_B_DEFAULT):
    """x: (B, INPUT_DIM) -> (B, ACTION_DIM) float32. Feed bf16 x + bf16 weights."""
    w1, b1, w2, b2, w3, b3 = params
    B = x.shape[0]

    tb = _pick_tile(B, tile_b, 8)
    grid = (pl.cdiv(B, tb),)

    # x / out stream one batch tile per grid step (auto double-buffered);
    # weights / biases use a constant index_map so they stay VMEM-resident.
    x_spec = pl.BlockSpec((tb, INPUT_DIM), lambda i: (i, 0))
    out_spec = pl.BlockSpec((tb, ACTION_DIM), lambda i: (i, 0))
    const = lambda i: (0, 0)
    w_specs = [
        pl.BlockSpec((INPUT_DIM, HIDDEN), const),
        pl.BlockSpec((1, HIDDEN), const),
        pl.BlockSpec((HIDDEN, HIDDEN), const),
        pl.BlockSpec((1, HIDDEN), const),
        pl.BlockSpec((HIDDEN, ACTION_DIM), const),
        pl.BlockSpec((1, ACTION_DIM), const),
    ]

    flops, bytes_accessed = _flops_bytes(B, x, params)

    return pl.pallas_call(
        critic2_kernel,
        out_shape=jax.ShapeDtypeStruct((B, ACTION_DIM), jnp.float32),
        grid=grid,
        in_specs=[x_spec] + w_specs,
        out_specs=out_spec,
        compiler_params=pltpu.CompilerParams(
            dimension_semantics=("parallel",),
        ),
        cost_estimate=pl.CostEstimate(
            flops=flops, transcendentals=0, bytes_accessed=bytes_accessed),
    )(x, w1, b1, w2, b2, w3, b3)


# =============================================================================
# Feature-major kernel: batch on the lane / MXU-N axis.
#   x_t (INPUT_DIM, tb); weights in nn.Linear layout (out, in); out (4, tb).
# =============================================================================
def critic2_t_kernel(xt_ref, w1_ref, b1_ref, w2_ref, b2_ref, w3_ref, b3_ref, o_ref):
    xt = xt_ref[...]                                                    # (145, tb)
    h1 = jnp.dot(w1_ref[...], xt, preferred_element_type=jnp.float32) + b1_ref[...]
    h1 = jnp.maximum(h1, 0.0)                                           # (64, tb)
    h2 = jnp.dot(w2_ref[...], h1.astype(w2_ref.dtype),
                 preferred_element_type=jnp.float32) + b2_ref[...]
    h2 = jnp.maximum(h2, 0.0)                                           # (64, tb)
    out = jnp.dot(w3_ref[...], h2.astype(w3_ref.dtype),
                  preferred_element_type=jnp.float32) + b3_ref[...]     # (4, tb)
    o_ref[...] = out.astype(o_ref.dtype)


@functools.partial(jax.jit, static_argnames=("tile_b",))
def critic2_forward_feature_major(x_t, params_t, *, tile_b=TILE_B_DEFAULT):
    """x_t: (INPUT_DIM, B) -> (ACTION_DIM, B) float32; params_t in (out, in) layout."""
    w1, b1, w2, b2, w3, b3 = params_t
    B = x_t.shape[1]

    tb = _pick_tile(B, tile_b, 128)   # lane axis: multiple of 128
    grid = (pl.cdiv(B, tb),)

    x_spec = pl.BlockSpec((INPUT_DIM, tb), lambda i: (0, i))
    out_spec = pl.BlockSpec((ACTION_DIM, tb), lambda i: (0, i))
    const = lambda i: (0, 0)
    w_specs = [
        pl.BlockSpec((HIDDEN, INPUT_DIM), const),
        pl.BlockSpec((HIDDEN, 1), const),
        pl.BlockSpec((HIDDEN, HIDDEN), const),
        pl.BlockSpec((HIDDEN, 1), const),
        pl.BlockSpec((ACTION_DIM, HIDDEN), const),
        pl.BlockSpec((ACTION_DIM, 1), const),
    ]

    flops, bytes_accessed = _flops_bytes(B, x_t, params_t)

    return pl.pallas_call(
        critic2_t_kernel,
        out_shape=jax.ShapeDtypeStruct((ACTION_DIM, B), jnp.float32),
        grid=grid,
        in_specs=[x_spec] + w_specs,
        out_specs=out_spec,
        compiler_params=pltpu.CompilerParams(
            dimension_semantics=("parallel",),
        ),
        cost_estimate=pl.CostEstimate(
            flops=flops, transcendentals=0, bytes_accessed=bytes_accessed),
    )(x_t, w1, b1, w2, b2, w3, b3)


# =============================================================================
# Params / reference
# =============================================================================
def init_linear(key, fan_in, fan_out, w_dtype=jnp.bfloat16):
    """Deterministic init matching nn.Linear's default U(-1/sqrt(fan_in), +)."""
    kw, kb = jax.random.split(key)
    bound = 1.0 / math.sqrt(fan_in)
    # stored (in, out) so the batch-major kernel computes x @ W
    w = jax.random.uniform(kw, (fan_in, fan_out), jnp.float32, -bound, bound)
    b = jax.random.uniform(kb, (1, fan_out), jnp.float32, -bound, bound)
    return w.astype(w_dtype), b  # biases stay f32 (accumulation dtype)


def init_params(key, w_dtype=jnp.bfloat16):
    """bf16 weights by default (halves HBM on x/W, avoids f32 MXU emulation)."""
    k1, k2, k3 = jax.random.split(key, 3)
    w1, b1 = init_linear(k1, INPUT_DIM, HIDDEN, w_dtype)
    w2, b2 = init_linear(k2, HIDDEN, HIDDEN, w_dtype)
    w3, b3 = init_linear(k3, HIDDEN, ACTION_DIM, w_dtype)
    return (w1, b1, w2, b2, w3, b3)


def to_feature_major(params):
    """(in, out) weights / (1, out) biases -> nn.Linear-native (out, in) / (out, 1)."""
    w1, b1, w2, b2, w3, b3 = params
    return (w1.T, b1.T, w2.T, b2.T, w3.T, b3.T)


def reference_forward(x, params):
    """Pure-JAX reference mirroring the kernels' dtype handling.

    NOTE: in the bf16 path h1/h2 are rounded to bf16 between layers (matches
    the kernels, not the f32 PyTorch module) -- intentional accuracy trade.
    """
    w1, b1, w2, b2, w3, b3 = params
    h1 = jnp.maximum(jnp.dot(x, w1, preferred_element_type=jnp.float32) + b1, 0.0)
    h2 = jnp.maximum(
        jnp.dot(h1.astype(w2.dtype), w2, preferred_element_type=jnp.float32) + b2, 0.0)
    return jnp.dot(h2.astype(w3.dtype), w3, preferred_element_type=jnp.float32) + b3


if __name__ == "__main__":
    key = jax.random.PRNGKey(0)
    k_params, k_x, k_x2 = jax.random.split(key, 3)

    # --- small f32 correctness check (batch=2), batch-major kernel -----------
    params_f32 = init_params(k_params, jnp.float32)
    batch = 2
    x = jax.random.normal(k_x, (batch, INPUT_DIM), jnp.float32)

    out = jax.block_until_ready(critic2_forward(x, params_f32))
    ref = reference_forward(x, params_f32)
    assert out.shape == (batch, ACTION_DIM), out.shape
    assert jnp.allclose(out, ref, atol=1e-4, rtol=1e-4), (
        "f32 mismatch vs pure-JAX reference")

    # --- default bf16 path, batch-tiled / megacore, batch-major --------------
    params_bf16 = init_params(k_params)                     # bf16 weights (default)
    big_batch = 4096
    x_big = jax.random.normal(k_x2, (big_batch, INPUT_DIM), jnp.bfloat16)  # producer emits bf16

    out_big = jax.block_until_ready(critic2_forward(x_big, params_bf16))
    ref_big = reference_forward(x_big, params_bf16)
    assert out_big.shape == (big_batch, ACTION_DIM), out_big.shape
    assert jnp.allclose(out_big, ref_big, atol=2e-2, rtol=2e-2), (
        "bf16 mismatch vs pure-JAX reference (batch-major)")

    # --- feature-major (batch-on-lane) kernel ---------------------------------
    # Stands in for a producer that emits x feature-major and keeps weights in
    # nn.Linear's native (out, in) layout (done once, outside the hot path).
    params_t = to_feature_major(params_bf16)
    x_big_t = jnp.asarray(x_big.T)

    out_t = jax.block_until_ready(critic2_forward_feature_major(x_big_t, params_t))
    assert out_t.shape == (ACTION_DIM, big_batch), out_t.shape
    assert jnp.allclose(out_t.T, ref_big, atol=2e-2, rtol=2e-2), (
        "bf16 mismatch vs pure-JAX reference (feature-major)")

    print("KERNEL_OK")
</pallas_src>

<mosaic_0001>
module attributes {stable_mosaic.version = 11 : i64} {
  func.func @critic2_kernel(%arg0: i32, %arg1: memref<8x145xf32, #tpu.memory_space<vmem>>, %arg2: memref<145x64xf32, #tpu.memory_space<vmem>>, %arg3: memref<1x64xf32, #tpu.memory_space<vmem>>, %arg4: memref<64x64xf32, #tpu.memory_space<vmem>>, %arg5: memref<1x64xf32, #tpu.memory_space<vmem>>, %arg6: memref<64x4xf32, #tpu.memory_space<vmem>>, %arg7: memref<1x4xf32, #tpu.memory_space<vmem>>, %arg8: memref<8x4xf32, #tpu.memory_space<vmem>>) attributes {dimension_semantics = [#tpu.dimension_semantics<parallel>], iteration_bounds = array<i64: 1>, scalar_prefetch = 0 : i64, scratch_operands = 0 : i64, tpu.core_type = #tpu.core_type<tc>, window_params = [{transform_indices = @transform_0, window_bounds = array<i64: 8, 145>}, {pipeline_mode = #tpu.pipeline_mode<synchronous>, transform_indices = @transform_1, window_bounds = array<i64: 145, 64>}, {pipeline_mode = #tpu.pipeline_mode<synchronous>, transform_indices = @transform_2, window_bounds = array<i64: 1, 64>}, {pipeline_mode = #tpu.pipeline_mode<synchronous>, transform_indices = @transform_3, window_bounds = array<i64: 64, 64>}, {pipeline_mode = #tpu.pipeline_mode<synchronous>, transform_indices = @transform_4, window_bounds = array<i64: 1, 64>}, {pipeline_mode = #tpu.pipeline_mode<synchronous>, transform_indices = @transform_5, window_bounds = array<i64: 64, 4>}, {pipeline_mode = #tpu.pipeline_mode<synchronous>, transform_indices = @transform_6, window_bounds = array<i64: 1, 4>}, {transform_indices = @transform_7, window_bounds = array<i64: 8, 4>}]} {
    %c0 = arith.constant 0 : index
    %c0_0 = arith.constant 0 : index
    %0 = vector.load %arg1[%c0, %c0_0] : memref<8x145xf32, #tpu.memory_space<vmem>>, vector<8x145xf32>
    %c0_1 = arith.constant 0 : index
    %c0_2 = arith.constant 0 : index
    %1 = vector.load %arg2[%c0_1, %c0_2] : memref<145x64xf32, #tpu.memory_space<vmem>>, vector<145x64xf32>
    %cst = arith.constant dense<0.000000e+00> : vector<8x64xf32>
    %2 = tpu.matmul %0, %1, %cst {dimension_numbers = #tpu.dot_dimension_numbers<[1], [0], [0], [1], [0, 0, 1, 1], [], []>} : vector<8x145xf32>, vector<145x64xf32>, vector<8x64xf32> -> vector<8x64xf32>
    %c0_3 = arith.constant 0 : index
    %c0_4 = arith.constant 0 : index
    %3 = vector.load %arg3[%c0_3, %c0_4] : memref<1x64xf32, #tpu.memory_space<vmem>>, vector<1x64xf32>
    %4 = vector.broadcast %3 : vector<1x64xf32> to vector<8x64xf32>
    %5 = arith.addf %2, %4 : vector<8x64xf32>
    %cst_5 = arith.constant 0.000000e+00 : f32
    %6 = vector.broadcast %cst_5 : f32 to vector<8x64xf32>
    %7 = arith.maximumf %5, %6 : vector<8x64xf32>
    %c0_6 = arith.constant 0 : index
    %c0_7 = arith.constant 0 : index
    %8 = vector.load %arg4[%c0_6, %c0_7] : memref<64x64xf32, #tpu.memory_space<vmem>>, vector<64x64xf32>
    %cst_8 = arith.constant dense<0.000000e+00> : vector<8x64xf32>
    %9 = tpu.matmul %7, %8, %cst_8 {dimension_numbers = #tpu.dot_dimension_numbers<[1], [0], [0], [1], [0, 0, 1, 1], [], []>} : vector<8x64xf32>, vector<64x64xf32>, vector<8x64xf32> -> vector<8x64xf32>
    %c0_9 = arith.constant 0 : index
    %c0_10 = arith.constant 0 : index
    %10 = vector.load %arg5[%c0_9, %c0_10] : memref<1x64xf32, #tpu.memory_space<vmem>>, vector<1x64xf32>
    %11 = vector.broadcast %10 : vector<1x64xf32> to vector<8x64xf32>
    %12 = arith.addf %9, %11 : vector<8x64xf32>
    %cst_11 = arith.constant 0.000000e+00 : f32
    %13 = vector.broadcast %cst_11 : f32 to vector<8x64xf32>
    %14 = arith.maximumf %12, %13 : vector<8x64xf32>
    %c0_12 = arith.constant 0 : index
    %c0_13 = arith.constant 0 : index
    %15 = vector.load %arg6[%c0_12, %c0_13] : memref<64x4xf32, #tpu.memory_space<vmem>>, vector<64x4xf32>
    %cst_14 = arith.constant dense<0.000000e+00> : vector<8x4xf32>
    %16 = tpu.matmul %14, %15, %cst_14 {dimension_numbers = #tpu.dot_dimension_numbers<[1], [0], [0], [1], [0, 0, 1, 1], [], []>} : vector<8x64xf32>, vector<64x4xf32>, vector<8x4xf32> -> vector<8x4xf32>
    %c0_15 = arith.constant 0 : index
    %c0_16 = arith.constant 0 : index
    %17 = vector.load %arg7[%c0_15, %c0_16] : memref<1x4xf32, #tpu.memory_space<vmem>>, vector<1x4xf32>
    %18 = vector.broadcast %17 : vector<1x4xf32> to vector<8x4xf32>
    %19 = arith.addf %16, %18 : vector<8x4xf32>
    %c0_17 = arith.constant 0 : index
    %c0_18 = arith.constant 0 : index
    %20 = vector.load %arg8[%c0_17, %c0_18] : memref<8x4xf32, #tpu.memory_space<vmem>>, vector<8x4xf32>
    tpu.vector_store %arg8[%c0_17, %c0_18], %19 {strides = array<i32>} : memref<8x4xf32, #tpu.memory_space<vmem>>, vector<8x4xf32>,
    return
  }
  func.func @transform_0(%arg0: i32) -> (i32, i32) {
    %c0_i32 = arith.constant 0 : i32
    %c0_i32_0 = arith.constant 0 : i32
    return %arg0, %c0_i32 : i32, i32
  }
  func.func @transform_1(%arg0: i32) -> (i32, i32) {
    %c0_i32 = arith.constant 0 : i32
    %c0_i32_0 = arith.constant 0 : i32
    %c0_i32_1 = arith.constant 0 : i32
    return %c0_i32, %c0_i32_0 : i32, i32
  }
  func.func @transform_2(%arg0: i32) -> (i32, i32) {
    %c0_i32 = arith.constant 0 : i32
    %c0_i32_0 = arith.constant 0 : i32
    %c0_i32_1 = arith.constant 0 : i32
    return %c0_i32, %c0_i32_0 : i32, i32
  }
  func.func @transform_3(%arg0: i32) -> (i32, i32) {
    %c0_i32 = arith.constant 0 : i32
    %c0_i32_0 = arith.constant 0 : i32
    %c0_i32_1 = arith.constant 0 : i32
    return %c0_i32, %c0_i32_0 : i32, i32
  }
  func.func @transform_4(%arg0: i32) -> (i32, i32) {
    %c0_i32 = arith.constant 0 : i32
    %c0_i32_0 = arith.constant 0 : i32
    %c0_i32_1 = arith.constant 0 : i32
    return %c0_i32, %c0_i32_0 : i32, i32
  }
  func.func @transform_5(%arg0: i32) -> (i32, i32) {
    %c0_i32 = arith.constant 0 : i32
    %c0_i32_0 = arith.constant 0 : i32
    %c0_i32_1 = arith.constant 0 : i32
    return %c0_i32, %c0_i32_0 : i32, i32
  }
  func.func @transform_6(%arg0: i32) -> (i32, i32) {
    %c0_i32 = arith.constant 0 : i32
    %c0_i32_0 = arith.constant 0 : i32
    %c0_i32_1 = arith.constant 0 : i32
    return %c0_i32, %c0_i32_0 : i32, i32
  }
  func.func @transform_7(%arg0: i32) -> (i32, i32) {
    %c0_i32 = arith.constant 0 : i32
    %c0_i32_0 = arith.constant 0 : i32
    return %arg0, %c0_i32 : i32, i32
  }
}

</mosaic_0001>

<bundles_post_ra>
// kernel: critic2_forward.1
= control target key start
LH: loop header
LB: loop body
LE: loop exit
PB: predicated region body
PF: predicated region fallthrough
CT: control target
= control target key end

     0   :  { %12 = vsyncpa [#allocation3], 0  ;;  %vm71_vm0 = vcmask 1040384   ;;  %vm68_vm1 = vcmask 138240   ;;  %vm128_vm2 = vcmask 523264   ;;  %vm188_vm3 = vcmask 31744   ;;  %s416_s0 = inlined_call_operand.vmem [shape: f32[2,145], index: 0, kind: input, shape index: {}]   ;;  %s417_s1 = inlined_call_operand.vmem [shape: f32[145,64], index: 1, kind: input, shape index: {}]   ;;  %s418_s2 = inlined_call_operand.vmem [shape: f32[1,64], index: 2, kind: input, shape index: {}]   ;;  %s419_s3 = inlined_call_operand.vmem [shape: f32[64,64], index: 3, kind: input, shape index: {}]   ;;  %s420_s4 = inlined_call_operand.vmem [shape: f32[1,64], index: 4, kind: input, shape index: {}]   ;;  %s421_s5 = inlined_call_operand.vmem [shape: f32[64,4], index: 5, kind: input, shape index: {}]   ;;  %s422_s6 = inlined_call_operand.vmem [shape: f32[1,4], index: 6, kind: input, shape index: {}]   ;;  %s423_s7 = inlined_call_operand.hbm [shape: f32[2,4], index: 7, kind: output, shape index: {}]  }
   0x1   :  { %v46_v0 = vld [vmem:[%s417_s1 + $0x78] sm:$0xff]  ;;  %v45_v1 = vld [vmem:[%s417_s1 + $0x70] sm:$0xff]  ;;  %v44_v2 = vld [vmem:[%s417_s1 + $0x68] sm:$0xff] }
   0x2   :  { %75 = vmatpush.msra.mxu0 %v46_v0  ;;  %v43_v3 = vld [vmem:[%s417_s1 + $0x60] sm:$0xff]  ;;  %v42_v4 = vld [vmem:[%s417_s1 + $0x58] sm:$0xff]  ;;  %v49_v5 = vld [vmem:[%s417_s1 + $0x90] sm:$0x1] }
   0x3   :  { %v41_v6 = vld [vmem:[%s417_s1 + $0x50] sm:$0xff]  ;;  %208 = vmatpush.msk.msra.mxu1 %vm71_vm0, %v49_v5  ;;  %v48_v7 = vld [vmem:[%s417_s1 + $0x88] sm:$0xff]  ;;  %v27_v8 = vld [vmem:[%s416_s0] sm:$0xf] }
   0x4   :  { %76 = vmatpush.msra.mxu0 %v45_v1  ;;  %v28_v9 = vld [vmem:[%s416_s0 + $0x4] sm:$0xf]  ;;  %v29_v10 = vld [vmem:[%s416_s0 + $0x8] sm:$0xf]  ;;  %v30_v11 = vld [vmem:[%s416_s0 + $0xc] sm:$0xf] }
   0x5   :  { %58 = vst [vmem:[#allocation1] ss:$4 sm:$0xff] %v27_v8  ;;  %109 = vmatpush.msra.mxu1 %v48_v7  ;;  %v47_v12 = vld [vmem:[%s417_s1 + $0x80] sm:$0xff]  ;;  %v123_v13 = vld [vmem:[%s419_s3 + $0x38] sm:$0xff]  ;;  %v122_v14 = vld [vmem:[%s419_s3 + $0x30] sm:$0xff] }
   0x6   :  { %77 = vmatpush.msra.mxu0 %v44_v2  ;;  %60 = vst [vmem:[#allocation1 + $0x1] ss:$4 sm:$0xff] %v28_v9  ;;  %140 = vmatpush.msra.mxu2 %v123_v13  ;;  %v40_v15 = vld [vmem:[%s417_s1 + $0x48] sm:$0xff]  ;;  %v39_v17 = vld [vmem:[%s417_s1 + $0x40] sm:$0xff]  ;;  %v38_v19 = vld [vmem:[%s417_s1 + $0x38] sm:$0xff] }
   0x7   :  { %62 = vst [vmem:[#allocation1 + $0x2] ss:$4 sm:$0xff] %v29_v10  ;;  %110 = vmatpush.msra.mxu1 %v47_v12  ;;  %v121_v16 = vld [vmem:[%s419_s3 + $0x28] sm:$0xff]  ;;  %v120_v18 = vld [vmem:[%s419_s3 + $0x20] sm:$0xff]  ;;  %v37_v20 = vld [vmem:[%s417_s1 + $0x30] sm:$0xff] }
   0x8   :  { %78 = vmatpush.msra.mxu0 %v43_v3  ;;  %64 = vst [vmem:[#allocation1 + $0x3] ss:$4 sm:$0xff] %v30_v11  ;;  %141 = vmatpush.msra.mxu2 %v122_v14  ;;  %v36_v22 = vld [vmem:[%s417_s1 + $0x28] sm:$0xff]  ;;  %v35_v23 = vld [vmem:[%s417_s1 + $0x20] sm:$0xff]  ;;  %v34_v24 = vld [vmem:[%s417_s1 + $0x18] sm:$0xff] }
   0x9   :  { %v33_v25 = vld [vmem:[%s417_s1 + $0x10] sm:$0xff]  ;;  %v32_v26 = vld [vmem:[%s417_s1 + $0x8] sm:$0xff]  ;;  %v31_v27 = vld [vmem:[%s417_s1] sm:$0xff] }
   0xa   :  { %79 = vmatpush.msra.mxu0 %v42_v4  ;;  %142 = vmatpush.msra.mxu2 %v121_v16  ;;  %v119_v29 = vld [vmem:[%s419_s3 + $0x18] sm:$0xff]  ;;  %v118_v30 = vld [vmem:[%s419_s3 + $0x10] sm:$0xff]  ;;  %v117_v31 = vld [vmem:[%s419_s3 + $0x8] sm:$0xff] }
   0xb   :  { %v116_v32 = vld [vmem:[%s419_s3] sm:$0xff]  ;;  %v160_v33 = vld [vmem:[%s421_s5 + $0x38] sm:$0xff]  ;;  %v159_v34 = vld [vmem:[%s421_s5 + $0x30] sm:$0xff] }
   0xc   :  { %80 = vmatpush.msra.mxu0 %v41_v6  ;;  %143 = vmatpush.msra.mxu2 %v120_v18  ;;  %v158_v35 = vld [vmem:[%s421_s5 + $0x28] sm:$0xff]  ;;  %v157_v36 = vld [vmem:[%s421_s5 + $0x20] sm:$0xff]  ;;  %v156_v37 = vld [vmem:[%s421_s5 + $0x18] sm:$0xff] }
   0xd   :  { %176 = vmatpush.msra.mxu3 %v160_v33  ;;  %v215_v38 = vld [vmem:[%s418_s2] ss:$0 sm:$0xff]  ;;  %v155_v44 = vld [vmem:[%s421_s5 + $0x10] sm:$0xff]  ;;  %v154_v45 = vld [vmem:[%s421_s5 + $0x8] sm:$0xff] }
   0xe   :  { %81 = vmatpush.msra.mxu0 %v40_v15  ;;  %144 = vmatpush.msra.mxu2 %v119_v29  ;;  %v153_v46 = vld [vmem:[%s421_s5] sm:$0xff] }
   0xf   :  { %v66_v21 = vld.sshfl [vmem:[#allocation1 + $0x8] sm:$0xff pattern:$0x73625140]  ;;  %v65_v28 = vld.sshfl [vmem:[#allocation1] sm:$0xff pattern:$0x73625140]  ;;  %177 = vmatpush.msra.mxu3 %v159_v34 }
  0x10   :  { %82 = vmatpush.msra.mxu0 %v39_v17  ;;  %209 = vmatmul.msk.f32.vlgmr.msra.gmra.mxu1 %vm68_vm1, %v66_v21  ;;  %v216_v47 = vld [vmem:[%s420_s4] ss:$0 sm:$0xff] }
  0x11   :  { %145 = vmatpush.msra.mxu2 %v118_v30  ;;  %178 = vmatpush.msra.mxu3 %v158_v35  ;;  %v217_v51 = vld [vmem:[%s422_s6] ss:$0 sm:$0xff] }
  0x12   :  { %83 = vmatpush.msra.mxu0 %v38_v19 }
  0x13   :  { %146 = vmatpush.msra.mxu2 %v117_v31  ;;  %179 = vmatpush.msra.mxu3 %v157_v36 }
  0x14   :  { %84 = vmatpush.msra.mxu0 %v37_v20 }
  0x15   :  { %147 = vmatpush.msra.mxu2 %v116_v32  ;;  %180 = vmatpush.msra.mxu3 %v156_v37 }
  0x16   :  { %85 = vmatpush.msra.mxu0 %v36_v22 }
  0x17   :  { %181 = vmatpush.msra.mxu3 %v155_v44 }
  0x18   :  { %86 = vmatpush.msra.mxu0 %v35_v23 }
  0x19   :  { %182 = vmatpush.msra.mxu3 %v154_v45 }
  0x1a   :  { %87 = vmatpush.msra.mxu0 %v34_v24 }
  0x1b   :  { %183 = vmatpush.msra.mxu3 %v153_v46 }
  0x1c   :  { %88 = vmatpush.msra.mxu0 %v33_v25 }
  0x1e   :  { %89 = vmatpush.msra.mxu0 %v32_v26 }
  0x20   :  { %90 = vmatpush.msra.mxu0 %v31_v27 }
  0x21   :  { %91 = vmatmul.f32.vlgmr.msra.gmra.mxu0 %v65_v28 }
  0x8d   :  { %v112_v40 = vpop.f32.mrf.mxu1 }
  0x9e   :  { %v92_v39 = vpop.f32.mrf.mxu0 }
  0x9f   :  { %v93_v41 = vadd.f32 %v215_v38, %v92_v39 }
  0xa1   :  { %v113_v42 = vadd.f32 %v112_v40, %v93_v41 }
  0xa3   :  { %v115_v43 = vmax.f32 %v113_v42, 0.0 }
  0xa5   :  { %210 = vmatmul.msk.f32.vlgmr.msra.gmra.mxu2 %vm128_vm2, %v115_v43 }
 0x128   :  { %v149_v48 = vpop.f32.mrf.mxu2 }
 0x129   :  { %v150_v49 = vadd.f32 %v216_v47, %v149_v48 }
 0x12b   :  { %v152_v50 = vmax.f32 %v150_v49, 0.0 }
 0x12d   :  { %211 = vmatmul.msk.f32.vlgmr.msra.gmra.mxu3 %vm128_vm2, %v152_v50 }
 0x1b0   :  { %v185_v52 = vpop.f32.mrf.mxu3 }
 0x1b1   :  { %v186_v53 = vadd.f32 %v217_v51, %v185_v52 }
 0x1b3   :  { %189 = vst.msk [vmem:[#allocation2] sm:$0xff] %vm188_vm3, %v186_v53 }
 0x1b4   :  { %193 = vsyncadd [#allocation3], 96  ;;  %s196_s11 = sshll.u32 %s423_s7, 4  ;;  %s244_s12 = smov [#allocation2]   ;;  %s197_s11 = int_to_ptr.hbm [resolvable:$true] %s196_s11 }
 0x1b5   :  { %s194_s1 = sshll.u32 %s244_s12, 4  ;;  %s245_s4 = smov 32   ;;  %s195_s1 = int_to_ptr.vmem [resolvable:$true] %s194_s1 }
 0x1b6   :  { %s246_s13 = smov 2  }
 0x1b7   :  { %202 = dma.vmem_to_hbm [thread:$0]  %s195_s1, 32, %s197_s11, [#allocation3], %s245_s4, %s245_s4, %s246_s13  }
 0x1b8   :  { %242 = dma.done.wait [#allocation3], 128  }
 0x1b9   :  { %243 = vsyncadd [#allocation3], 4294967168 }
 0x1ba   :  { %207 = vsyncpa [#allocation3], 1 }

</bundles_post_ra>
